<compile_context>
chip_gen: v6e
topology: v6e:2x2x1
jax: 0.10.0
libtpu: 0.0.40
codegen_flags: <defaults>
</compile_context>

<pallas_src>
import functools

import jax
import jax.numpy as jnp
from jax.experimental import pallas as pl
from jax.experimental.pallas import tpu as pltpu


def _round_up(x, m):
    return -(-x // m) * m


def _actor_kernel(x_ref,
                  w1_ref, b1_ref,
                  w2_ref, b2_ref,
                  w3_ref, b3_ref,
                  wh_ref, bh_ref,
                  out_ref,
                  *, action_limit, out_size):
    x = x_ref[...]

    # fc1 -> relu -> fc2 -> relu -> fc3 -> relu
    h = jnp.dot(x, w1_ref[...], preferred_element_type=jnp.float32) + b1_ref[...]
    h = jnp.maximum(h, 0.0)
    h = jnp.dot(h, w2_ref[...], preferred_element_type=jnp.float32) + b2_ref[...]
    h = jnp.maximum(h, 0.0)
    h = jnp.dot(h, w3_ref[...], preferred_element_type=jnp.float32) + b3_ref[...]
    h = jnp.maximum(h, 0.0)

    # Fused heads against an MXU-aligned 128-lane padded weight; only the
    # first 2*out_size columns are real.  Slice before the epilogue so the
    # store (and the select) are done at the real output width.
    z_full = jnp.dot(h, wh_ref[...], preferred_element_type=jnp.float32) + bh_ref[...]
    z = z_full[:, : 2 * out_size]

    mean_vals = jnp.tanh(z) * action_limit
    # PyTorch F.softplus (beta=1, threshold=20), numerically stable form.
    sp = jnp.log1p(jnp.exp(-jnp.abs(z))) + jnp.maximum(z, 0.0)
    s2_vals = jnp.where(z > 20.0, z, sp)

    col = jax.lax.broadcasted_iota(jnp.int32, z.shape, 1)
    out_ref[...] = jnp.where(col < out_size, mean_vals, s2_vals)


def fuse_actor_params(params):
    """One-time prep: concat fc_mean/fc_s2 into a single lane-padded head."""
    (w1, b1), (w2, b2), (w3, b3), (wm, bm), (ws, bs) = params
    out_size = wm.shape[1]
    head_w = jnp.concatenate([wm, ws], axis=1)   # (h3, 2*out_size)
    head_b = jnp.concatenate([bm, bs], axis=1)   # (1,  2*out_size)
    pad_n = max(128, _round_up(2 * out_size, 128))
    head_w = jnp.pad(head_w, ((0, 0), (0, pad_n - 2 * out_size)))
    head_b = jnp.pad(head_b, ((0, 0), (0, pad_n - 2 * out_size)))
    return (w1, b1, w2, b2, w3, b3, head_w, head_b)


def actor_forward(x, fused_params, *, agent_num, action_space,
                  action_limit=1.0, batch_tile=4096):
    """Runs the ActorNetwork forward pass. x: (B, input_size) float32."""
    w1, b1, w2, b2, w3, b3, head_w, head_b = fused_params
    B, in_size = x.shape
    h1 = w1.shape[1]
    h2 = w2.shape[1]
    h3 = w3.shape[1]
    pad_n = head_w.shape[1]
    out_size = agent_num * action_space
    out2 = 2 * out_size

    # Batch tile: biggest that fits (default 4096), capped so the grid has at
    # least 2 steps (lets v7x shard the "parallel" axis across both TCs) and
    # never wider than the (8-aligned) batch.  No jnp.pad of x: the ragged
    # last block is handled by the cdiv grid (OOB writes are dropped).
    half = _round_up(-(-B // 2), 8)
    tb = max(8, min(_round_up(int(batch_tile), 8), half, _round_up(B, 8)))
    grid = (pl.cdiv(B, tb),)

    def resident(shape):
        # Parameters: full-array blocks with a constant index_map so they stay
        # resident in VMEM across grid steps (no per-step re-DMA).
        return pl.BlockSpec(shape, lambda i: (0, 0))

    kernel = functools.partial(_actor_kernel,
                               action_limit=float(action_limit),
                               out_size=int(out_size))

    flops = 2 * B * (in_size * h1 + h1 * h2 + h2 * h3 + h3 * pad_n)
    transcendentals = 3 * B * out2  # tanh, exp, log1p per real head element
    bytes_accessed = 4 * (B * (in_size + out2)
                          + in_size * h1 + h1
                          + h1 * h2 + h2
                          + h2 * h3 + h3
                          + h3 * pad_n + pad_n)
    cost = pl.CostEstimate(flops=flops,
                           transcendentals=transcendentals,
                           bytes_accessed=bytes_accessed)

    out = pl.pallas_call(
        kernel,
        out_shape=jax.ShapeDtypeStruct((B, out2), jnp.float32),
        grid_spec=pltpu.PrefetchScalarGridSpec(
            num_scalar_prefetch=0,
            grid=grid,
            in_specs=[
                pl.BlockSpec((tb, in_size), lambda i: (i, 0)),
                resident((in_size, h1)), resident((1, h1)),
                resident((h1, h2)),      resident((1, h2)),
                resident((h2, h3)),      resident((1, h3)),
                resident((h3, pad_n)),   resident((1, pad_n)),
            ],
            out_specs=pl.BlockSpec((tb, out2), lambda i: (i, 0)),
        ),
        compiler_params=pltpu.CompilerParams(
            dimension_semantics=("parallel",)),
        cost_estimate=cost,
    )(x, w1, b1, w2, b2, w3, b3, head_w, head_b)

    mean = out[:, :out_size].reshape(-1, agent_num, action_space)
    s2 = out[:, out_size:].reshape(-1, agent_num, action_space)
    return mean, s2


def init_params(key, input_size, hidden_size, output_size):
    """Deterministic synthetic init. Weights stored as (in, out)."""
    dims = [input_size] + list(hidden_size)
    sizes = [(dims[0], dims[1]), (dims[1], dims[2]), (dims[2], dims[3]),
             (dims[3], output_size), (dims[3], output_size)]
    keys = jax.random.split(key, len(sizes))
    layers = []
    for k, (fan_in, fan_out) in zip(keys, sizes):
        kw, kb = jax.random.split(k)
        bound = 1.0 / jnp.sqrt(fan_in)
        w = jax.random.uniform(kw, (fan_in, fan_out), jnp.float32, -bound, bound)
        b = jax.random.uniform(kb, (1, fan_out), jnp.float32, -bound, bound)
        layers.append((w, b))
    return layers


if __name__ == "__main__":
    # Shapes consistent with the module's forward:
    #   input_size=32, hidden_size=[64, 64, 64],
    #   agent_num=2, action_space=4 -> output_size = 8, action_limit=1
    batch = 250            # NOT a tile multiple -> exercises the ragged tail
    input_size = 32
    hidden_size = [64, 64, 64]
    agent_num = 2
    action_space = 4
    output_size = agent_num * action_space
    action_limit = 1.0

    key = jax.random.PRNGKey(0)
    k_params, k_x = jax.random.split(key)
    params = init_params(k_params, input_size, hidden_size, output_size)
    fused = fuse_actor_params(params)          # hoisted out of the call path
    x = jax.random.normal(k_x, (batch, input_size), jnp.float32)

    # With B=250 the tile caps at 128 -> grid=(2,), second block ragged.
    mean, s2 = actor_forward(x, fused,
                             agent_num=agent_num,
                             action_space=action_space,
                             action_limit=action_limit)
    jax.block_until_ready((mean, s2))

    # Sanity check against a plain-JAX reference of the same forward.
    def ref(x, params):
        (w1, b1), (w2, b2), (w3, b3), (wm, bm), (ws, bs) = params
        h = jnp.maximum(x @ w1 + b1, 0.0)
        h = jnp.maximum(h @ w2 + b2, 0.0)
        h = jnp.maximum(h @ w3 + b3, 0.0)
        m = jnp.tanh(h @ wm + bm) * action_limit
        s = jax.nn.softplus(h @ ws + bs)
        return (m.reshape(-1, agent_num, action_space),
                s.reshape(-1, agent_num, action_space))

    m_ref, s_ref = ref(x, params)
    assert mean.shape == (batch, agent_num, action_space)
    assert s2.shape == (batch, agent_num, action_space)
    assert jnp.allclose(mean, m_ref, atol=1e-5, rtol=1e-5)
    assert jnp.allclose(s2, s_ref, atol=1e-5, rtol=1e-5)

    print("KERNEL_OK")
</pallas_src>

<mosaic_0001>
module attributes {stable_mosaic.version = 11 : i64} {
  func.func @_actor_kernel(%arg0: i32, %arg1: memref<128x32xf32, #tpu.memory_space<vmem>>, %arg2: memref<32x64xf32, #tpu.memory_space<vmem>>, %arg3: memref<1x64xf32, #tpu.memory_space<vmem>>, %arg4: memref<64x64xf32, #tpu.memory_space<vmem>>, %arg5: memref<1x64xf32, #tpu.memory_space<vmem>>, %arg6: memref<64x64xf32, #tpu.memory_space<vmem>>, %arg7: memref<1x64xf32, #tpu.memory_space<vmem>>, %arg8: memref<64x128xf32, #tpu.memory_space<vmem>>, %arg9: memref<1x128xf32, #tpu.memory_space<vmem>>, %arg10: memref<128x16xf32, #tpu.memory_space<vmem>>) attributes {dimension_semantics = [#tpu.dimension_semantics<parallel>], iteration_bounds = array<i64: 2>, scalar_prefetch = 0 : i64, scratch_operands = 0 : i64, tpu.core_type = #tpu.core_type<tc>, window_params = [{transform_indices = @transform_0, window_bounds = array<i64: 128, 32>}, {pipeline_mode = #tpu.pipeline_mode<synchronous>, transform_indices = @transform_1, window_bounds = array<i64: 32, 64>}, {pipeline_mode = #tpu.pipeline_mode<synchronous>, transform_indices = @transform_2, window_bounds = array<i64: 1, 64>}, {pipeline_mode = #tpu.pipeline_mode<synchronous>, transform_indices = @transform_3, window_bounds = array<i64: 64, 64>}, {pipeline_mode = #tpu.pipeline_mode<synchronous>, transform_indices = @transform_4, window_bounds = array<i64: 1, 64>}, {pipeline_mode = #tpu.pipeline_mode<synchronous>, transform_indices = @transform_5, window_bounds = array<i64: 64, 64>}, {pipeline_mode = #tpu.pipeline_mode<synchronous>, transform_indices = @transform_6, window_bounds = array<i64: 1, 64>}, {pipeline_mode = #tpu.pipeline_mode<synchronous>, transform_indices = @transform_7, window_bounds = array<i64: 64, 128>}, {pipeline_mode = #tpu.pipeline_mode<synchronous>, transform_indices = @transform_8, window_bounds = array<i64: 1, 128>}, {transform_indices = @transform_9, window_bounds = array<i64: 128, 16>}]} {
    %c0 = arith.constant 0 : index
    %c0_0 = arith.constant 0 : index
    %0 = vector.load %arg1[%c0, %c0_0] : memref<128x32xf32, #tpu.memory_space<vmem>>, vector<128x32xf32>
    %c0_1 = arith.constant 0 : index
    %c0_2 = arith.constant 0 : index
    %1 = vector.load %arg2[%c0_1, %c0_2] : memref<32x64xf32, #tpu.memory_space<vmem>>, vector<32x64xf32>
    %cst = arith.constant dense<0.000000e+00> : vector<128x64xf32>
    %2 = tpu.matmul %0, %1, %cst {dimension_numbers = #tpu.dot_dimension_numbers<[1], [0], [0], [1], [0, 0, 1, 1], [], []>} : vector<128x32xf32>, vector<32x64xf32>, vector<128x64xf32> -> vector<128x64xf32>
    %c0_3 = arith.constant 0 : index
    %c0_4 = arith.constant 0 : index
    %3 = vector.load %arg3[%c0_3, %c0_4] : memref<1x64xf32, #tpu.memory_space<vmem>>, vector<1x64xf32>
    %4 = vector.broadcast %3 : vector<1x64xf32> to vector<128x64xf32>
    %5 = arith.addf %2, %4 : vector<128x64xf32>
    %cst_5 = arith.constant 0.000000e+00 : f32
    %6 = vector.broadcast %cst_5 : f32 to vector<128x64xf32>
    %7 = arith.maximumf %5, %6 : vector<128x64xf32>
    %c0_6 = arith.constant 0 : index
    %c0_7 = arith.constant 0 : index
    %8 = vector.load %arg4[%c0_6, %c0_7] : memref<64x64xf32, #tpu.memory_space<vmem>>, vector<64x64xf32>
    %cst_8 = arith.constant dense<0.000000e+00> : vector<128x64xf32>
    %9 = tpu.matmul %7, %8, %cst_8 {dimension_numbers = #tpu.dot_dimension_numbers<[1], [0], [0], [1], [0, 0, 1, 1], [], []>} : vector<128x64xf32>, vector<64x64xf32>, vector<128x64xf32> -> vector<128x64xf32>
    %c0_9 = arith.constant 0 : index
    %c0_10 = arith.constant 0 : index
    %10 = vector.load %arg5[%c0_9, %c0_10] : memref<1x64xf32, #tpu.memory_space<vmem>>, vector<1x64xf32>
    %11 = vector.broadcast %10 : vector<1x64xf32> to vector<128x64xf32>
    %12 = arith.addf %9, %11 : vector<128x64xf32>
    %cst_11 = arith.constant 0.000000e+00 : f32
    %13 = vector.broadcast %cst_11 : f32 to vector<128x64xf32>
    %14 = arith.maximumf %12, %13 : vector<128x64xf32>
    %c0_12 = arith.constant 0 : index
    %c0_13 = arith.constant 0 : index
    %15 = vector.load %arg6[%c0_12, %c0_13] : memref<64x64xf32, #tpu.memory_space<vmem>>, vector<64x64xf32>
    %cst_14 = arith.constant dense<0.000000e+00> : vector<128x64xf32>
    %16 = tpu.matmul %14, %15, %cst_14 {dimension_numbers = #tpu.dot_dimension_numbers<[1], [0], [0], [1], [0, 0, 1, 1], [], []>} : vector<128x64xf32>, vector<64x64xf32>, vector<128x64xf32> -> vector<128x64xf32>
    %c0_15 = arith.constant 0 : index
    %c0_16 = arith.constant 0 : index
    %17 = vector.load %arg7[%c0_15, %c0_16] : memref<1x64xf32, #tpu.memory_space<vmem>>, vector<1x64xf32>
    %18 = vector.broadcast %17 : vector<1x64xf32> to vector<128x64xf32>
    %19 = arith.addf %16, %18 : vector<128x64xf32>
    %cst_17 = arith.constant 0.000000e+00 : f32
    %20 = vector.broadcast %cst_17 : f32 to vector<128x64xf32>
    %21 = arith.maximumf %19, %20 : vector<128x64xf32>
    %c0_18 = arith.constant 0 : index
    %c0_19 = arith.constant 0 : index
    %22 = vector.load %arg8[%c0_18, %c0_19] : memref<64x128xf32, #tpu.memory_space<vmem>>, vector<64x128xf32>
    %cst_20 = arith.constant dense<0.000000e+00> : vector<128x128xf32>
    %23 = tpu.matmul %21, %22, %cst_20 {dimension_numbers = #tpu.dot_dimension_numbers<[1], [0], [0], [1], [0, 0, 1, 1], [], []>} : vector<128x64xf32>, vector<64x128xf32>, vector<128x128xf32> -> vector<128x128xf32>
    %c0_21 = arith.constant 0 : index
    %c0_22 = arith.constant 0 : index
    %24 = vector.load %arg9[%c0_21, %c0_22] : memref<1x128xf32, #tpu.memory_space<vmem>>, vector<1x128xf32>
    %25 = vector.broadcast %24 : vector<1x128xf32> to vector<128x128xf32>
    %26 = arith.addf %23, %25 : vector<128x128xf32>
    %27 = vector.extract_strided_slice %26 {offsets = [0, 0], sizes = [128, 16], strides = [1, 1]} : vector<128x128xf32> to vector<128x16xf32>
    %28 = math.tanh %27 : vector<128x16xf32>
    %cst_23 = arith.constant 1.000000e+00 : f32
    %29 = vector.broadcast %cst_23 : f32 to vector<128x16xf32>
    %30 = arith.mulf %28, %29 : vector<128x16xf32>
    %31 = math.absf %27 : vector<128x16xf32>
    %cst_24 = arith.constant 0.000000e+00 : f32
    %32 = vector.broadcast %cst_24 : f32 to vector<128x16xf32>
    %33 = arith.subf %32, %31 : vector<128x16xf32>
    %34 = math.exp %33 : vector<128x16xf32>
    %35 = math.log1p %34 : vector<128x16xf32>
    %cst_25 = arith.constant 0.000000e+00 : f32
    %36 = vector.broadcast %cst_25 : f32 to vector<128x16xf32>
    %37 = arith.maximumf %27, %36 : vector<128x16xf32>
    %38 = arith.addf %35, %37 : vector<128x16xf32>
    %cst_26 = arith.constant 2.000000e+01 : f32
    %39 = vector.broadcast %cst_26 : f32 to vector<128x16xf32>
    %40 = arith.cmpf ogt, %27, %39 : vector<128x16xf32>
    %41 = arith.select %40, %27, %38 : vector<128x16xi1>, vector<128x16xf32>
    %42 = tpu.iota {dimensions = array<i32: 1>} : vector<128x16xi32>
    %c8_i32 = arith.constant 8 : i32
    %43 = vector.broadcast %c8_i32 : i32 to vector<128x16xi32>
    %44 = arith.cmpi slt, %42, %43 : vector<128x16xi32>
    %45 = arith.select %44, %30, %41 : vector<128x16xi1>, vector<128x16xf32>
    %c0_27 = arith.constant 0 : index
    %c0_28 = arith.constant 0 : index
    %46 = vector.load %arg10[%c0_27, %c0_28] : memref<128x16xf32, #tpu.memory_space<vmem>>, vector<128x16xf32>
    tpu.vector_store %arg10[%c0_27, %c0_28], %45 {strides = array<i32>} : memref<128x16xf32, #tpu.memory_space<vmem>>, vector<128x16xf32>,
    return
  }
  func.func @transform_0(%arg0: i32) -> (i32, i32) {
    %c0_i32 = arith.constant 0 : i32
    %c0_i32_0 = arith.constant 0 : i32
    return %arg0, %c0_i32 : i32, i32
  }
  func.func @transform_1(%arg0: i32) -> (i32, i32) {
    %c0_i32 = arith.constant 0 : i32
    %c0_i32_0 = arith.constant 0 : i32
    %c0_i32_1 = arith.constant 0 : i32
    return %c0_i32, %c0_i32_0 : i32, i32
  }
  func.func @transform_2(%arg0: i32) -> (i32, i32) {
    %c0_i32 = arith.constant 0 : i32
    %c0_i32_0 = arith.constant 0 : i32
    %c0_i32_1 = arith.constant 0 : i32
    return %c0_i32, %c0_i32_0 : i32, i32
  }
  func.func @transform_3(%arg0: i32) -> (i32, i32) {
    %c0_i32 = arith.constant 0 : i32
    %c0_i32_0 = arith.constant 0 : i32
    %c0_i32_1 = arith.constant 0 : i32
    return %c0_i32, %c0_i32_0 : i32, i32
  }
  func.func @transform_4(%arg0: i32) -> (i32, i32) {
    %c0_i32 = arith.constant 0 : i32
    %c0_i32_0 = arith.constant 0 : i32
    %c0_i32_1 = arith.constant 0 : i32
    return %c0_i32, %c0_i32_0 : i32, i32
  }
  func.func @transform_5(%arg0: i32) -> (i32, i32) {
    %c0_i32 = arith.constant 0 : i32
    %c0_i32_0 = arith.constant 0 : i32
    %c0_i32_1 = arith.constant 0 : i32
    return %c0_i32, %c0_i32_0 : i32, i32
  }
  func.func @transform_6(%arg0: i32) -> (i32, i32) {
    %c0_i32 = arith.constant 0 : i32
    %c0_i32_0 = arith.constant 0 : i32
    %c0_i32_1 = arith.constant 0 : i32
    return %c0_i32, %c0_i32_0 : i32, i32
  }
  func.func @transform_7(%arg0: i32) -> (i32, i32) {
    %c0_i32 = arith.constant 0 : i32
    %c0_i32_0 = arith.constant 0 : i32
    %c0_i32_1 = arith.constant 0 : i32
    return %c0_i32, %c0_i32_0 : i32, i32
  }
  func.func @transform_8(%arg0: i32) -> (i32, i32) {
    %c0_i32 = arith.constant 0 : i32
    %c0_i32_0 = arith.constant 0 : i32
    %c0_i32_1 = arith.constant 0 : i32
    return %c0_i32, %c0_i32_0 : i32, i32
  }
  func.func @transform_9(%arg0: i32) -> (i32, i32) {
    %c0_i32 = arith.constant 0 : i32
    %c0_i32_0 = arith.constant 0 : i32
    return %arg0, %c0_i32 : i32, i32
  }
}

</mosaic_0001>

<bundles_post_ra>
// kernel: tpu_custom_call.1
= control target key start
LH: loop header
LB: loop body
LE: loop exit
PB: predicated region body
PF: predicated region fallthrough
CT: control target
= control target key end

     0   :  { %s2111_s30 = smov 0   ;;  %s2696_s0 = inlined_call_operand.vmem [shape: f32[250,32], index: 0, kind: input, shape index: {}]   ;;  %s2697_s1 = inlined_call_operand.vmem [shape: f32[32,64], index: 1, kind: input, shape index: {}]   ;;  %s2698_s2 = inlined_call_operand.vmem [shape: f32[1,64], index: 2, kind: input, shape index: {}]   ;;  %s2699_s3 = inlined_call_operand.vmem [shape: f32[64,64], index: 3, kind: input, shape index: {}]   ;;  %s2700_s4 = inlined_call_operand.vmem [shape: f32[1,64], index: 4, kind: input, shape index: {}]   ;;  %s2701_s5 = inlined_call_operand.vmem [shape: f32[64,64], index: 5, kind: input, shape index: {}]   ;;  %s2702_s6 = inlined_call_operand.vmem [shape: f32[1,64], index: 6, kind: input, shape index: {}]   ;;  %s2703_s7 = inlined_call_operand.vmem [shape: f32[64,128], index: 7, kind: input, shape index: {}]   ;;  %s2704_s8 = inlined_call_operand.vmem [shape: f32[1,128], index: 8, kind: input, shape index: {}]   ;;  %s2705_s9 = inlined_call_operand.vmem [shape: f32[250,16], index: 9, kind: output, shape index: {}]  }
   0x1 LB: > { %s1610_s10 = sadd.s32 4294967295, %s2059_s30   ;;  %p1614_p0 = scmp.ge.s32.totalorder %s2059_s30, 1  ;;  %s2059_s30 = sphi %s2111_s30, %s19_s30  }
   0x2   : > { %p288_p1 = scmp.lt.s32.totalorder %s2059_s30, 3 }
   0x4   : > { %p289_p2 = pnand %p1614_p0, %p288_p1 }
   0x5   : > { %s1615_s15 = sshll.u32 (!%p289_p2), %s1610_s10, 4 }
   0x6   : > { %292 = sbr.rel (%p289_p2) target bundleno = 922 (0x39a), region = 56  ;;  %p325_p3 = scmp.lt.s32.totalorder (!%p289_p2), %s1615_s15, 31 }
   0xb   : > { %v355_v0 = vld [vmem:[%s2697_s1 + $0x18] sm:$0xff]  ;;  %v354_v1 = vld [vmem:[%s2697_s1 + $0x10] sm:$0xff]  ;;  %v353_v4 = vld [vmem:[%s2697_s1 + $0x8] sm:$0xff]  ;;  %s2721_s15 = smov (!%p325_p3, %s1615_s15), 31  ;;  %vm363_vm0 = vcmask 261120   ;;  %vm588_vm1 = vcmask 523264  }
   0xc   : > { %1781 = vmatprep.subr.mxu0 %v355_v0  ;;  %v580_v2 = vld [vmem:[%s2699_s3 + $0x38] sm:$0xff]  ;;  %v579_v3 = vld [vmem:[%s2699_s3 + $0x30] sm:$0xff]  ;;  %v578_v5 = vld [vmem:[%s2699_s3 + $0x28] sm:$0xff]  ;;  %s1616_s26 = sshll.u32 %s2721_s15, 3  ;;  %vm1537_vm5 = vcmask 130048  }
   0xd   : > { %1782 = vmatpush3.msra.mxu0 %v355_v0  ;;  %1813 = vmatprep.subr.mxu1 %v580_v2  ;;  %v352_v6 = vld [vmem:[%s2697_s1] sm:$0xff]  ;;  %s2148_s29 = scalar_lea.vmem %s2696_s0, %s1616_s26  ;;  %v576_v24 = vld [vmem:[%s2699_s3 + $0x18] sm:$0xff]  ;;  %v575_v25 = vld [vmem:[%s2699_s3 + $0x10] sm:$0xff]  ;;  %s2478_s28 = scalar_lea.vmem %s2705_s9, %s1616_s26 }
   0xe   : > { %1783 = vmatprep.subr.mxu0 %v354_v1  ;;  %1814 = vmatpush3.msra.mxu1 %v580_v2  ;;  %v577_v7 = vld [vmem:[%s2699_s3 + $0x20] sm:$0xff]  ;;  %v337_v9 = vld [vmem:[%s2148_s29 + $0x8] sm:$0xff]  ;;  %v338_v10 = vld [vmem:[%s2148_s29 + $0x10] sm:$0xff] }
   0xf   : > { %1784 = vmatpush3.msra.mxu0 %v354_v1  ;;  %1815 = vmatprep.subr.mxu1 %v579_v3  ;;  %v336_v8 = vld [vmem:[%s2148_s29] sm:$0xff]  ;;  %v339_v11 = vld [vmem:[%s2148_s29 + $0x18] sm:$0xff]  ;;  %v341_v13 = vld [vmem:[%s2148_s29 + $0x28] sm:$0xff] }
  0x10   : > { %1785 = vmatprep.subr.mxu0 %v353_v4  ;;  %1816 = vmatpush3.msra.mxu1 %v579_v3  ;;  %v340_v12 = vld [vmem:[%s2148_s29 + $0x20] sm:$0xff]  ;;  %v342_v14 = vld [vmem:[%s2148_s29 + $0x30] sm:$0xff]  ;;  %v343_v15 = vld [vmem:[%s2148_s29 + $0x38] sm:$0xff] }
  0x11   : > { %1786 = vmatpush3.msra.mxu0 %v353_v4  ;;  %1817 = vmatprep.subr.mxu1 %v578_v5  ;;  %v344_v16 = vld [vmem:[%s2148_s29 + $0x40] sm:$0xff]  ;;  %v345_v17 = vld [vmem:[%s2148_s29 + $0x48] sm:$0xff]  ;;  %v346_v18 = vld [vmem:[%s2148_s29 + $0x50] sm:$0xff] }
  0x12   : > { %1787 = vmatprep.subr.mxu0 %v352_v6  ;;  %1818 = vmatpush3.msra.mxu1 %v578_v5  ;;  %v347_v19 = vld [vmem:[%s2148_s29 + $0x58] sm:$0xff]  ;;  %v348_v20 = vld [vmem:[%s2148_s29 + $0x60] sm:$0xff]  ;;  %v349_v21 = vld [vmem:[%s2148_s29 + $0x68] sm:$0xff] }
  0x13   : > { %1788 = vmatpush3.msra.mxu0 %v352_v6  ;;  %1789 = vmatprep.mubr.msk.f32.mxu0 %vm363_vm0, %v336_v8  ;;  %v350_v22 = vld [vmem:[%s2148_s29 + $0x70] sm:$0xff]  ;;  %v351_v23 = vld [vmem:[%s2148_s29 + $0x78] sm:$0xff]  ;;  %v574_v26 = vld [vmem:[%s2699_s3 + $0x8] sm:$0xff] }
  0x14   : > { %1790 = vmatmul.mubr.msk.f32.vlgmr.msra.gmra.mxu0 %vm363_vm0, %v337_v9  ;;  %1819 = vmatprep.subr.mxu1 %v577_v7  ;;  %v573_v27 = vld [vmem:[%s2699_s3] sm:$0xff]  ;;  %v805_v28 = vld [vmem:[%s2701_s5 + $0x38] sm:$0xff]  ;;  %v804_v29 = vld [vmem:[%s2701_s5 + $0x30] sm:$0xff] }
  0x15   : > { %1792 = vmatprep.mubr.msk.f32.mxu0 %vm363_vm0, %v338_v10  ;;  %1820 = vmatpush3.msra.mxu1 %v577_v7  ;;  %v803_v30 = vld [vmem:[%s2701_s5 + $0x28] sm:$0xff]  ;;  %v802_v31 = vld [vmem:[%s2701_s5 + $0x20] sm:$0xff]  ;;  %v801_v32 = vld [vmem:[%s2701_s5 + $0x18] sm:$0xff] }
  0x16   : > { %1821 = vmatprep.subr.mxu1 %v576_v24  ;;  %1853 = vmatprep.subr.mxu0 %v805_v28  ;;  %v800_v33 = vld [vmem:[%s2701_s5 + $0x10] sm:$0xff]  ;;  %v799_v34 = vld [vmem:[%s2701_s5 + $0x8] sm:$0xff]  ;;  %v1619_v35 = vld [vmem:[%s2698_s2] ss:$0 sm:$0xff] }
  0x17   : > { %1822 = vmatpush3.msra.mxu1 %v576_v24  ;;  %1854 = vmatpush3.msra.mxu0 %v805_v28  ;;  %v1026_v24 = vld [vmem:[%s2703_s7 + $0x20] sm:$0xff] }
  0x18   : > { %1793 = vmatmul.mubr.msk.f32.gmra.mxu0 %vm363_vm0, %v339_v11  ;;  %1823 = vmatprep.subr.mxu1 %v575_v25 }
  0x19   : > { %1795 = vmatprep.mubr.msk.f32.mxu0 %vm363_vm0, %v340_v12  ;;  %1824 = vmatpush3.msra.mxu1 %v575_v25  ;;  %v1025_v25 = vld [vmem:[%s2703_s7 + $0x18] sm:$0xff] }
  0x1a   : > { %1825 = vmatprep.subr.mxu1 %v574_v26  ;;  %1855 = vmatprep.subr.mxu0 %v804_v29 }
  0x1b   : > { %1826 = vmatpush3.msra.mxu1 %v574_v26  ;;  %1856 = vmatpush3.msra.mxu0 %v804_v29  ;;  %v1024_v26 = vld [vmem:[%s2703_s7 + $0x10] sm:$0xff] }
  0x1c   : > { %1796 = vmatmul.mubr.msk.f32.gmra.mxu0 %vm363_vm0, %v341_v13  ;;  %1827 = vmatprep.subr.mxu1 %v573_v27 }
  0x1d   : > { %1798 = vmatprep.mubr.msk.f32.mxu0 %vm363_vm0, %v342_v14  ;;  %1828 = vmatpush3.msra.mxu1 %v573_v27  ;;  %v2261_v27 = vld [vmem:[%s2700_s4] ss:$0 sm:$0xff] }
  0x1e   : > { %1857 = vmatprep.subr.mxu0 %v803_v30 }
  0x1f   : > { %1858 = vmatpush3.msra.mxu0 %v803_v30 }
  0x20   : > { %1799 = vmatmul.mubr.msk.f32.gmra.mxu0 %vm363_vm0, %v343_v15  ;;  %1859 = vmatprep.subr.mxu0 %v802_v31 }
  0x21   : > { %1801 = vmatprep.mubr.msk.f32.mxu0 %vm363_vm0, %v344_v16  ;;  %1860 = vmatpush3.msra.mxu0 %v802_v31 }
  0x22   : > { %1861 = vmatprep.subr.mxu0 %v801_v32 }
  0x23   : > { %1862 = vmatpush3.msra.mxu0 %v801_v32 }
  0x24   : > { %1802 = vmatmul.mubr.msk.f32.gmra.mxu0 %vm363_vm0, %v345_v17  ;;  %1863 = vmatprep.subr.mxu0 %v800_v33 }
  0x25   : > { %1804 = vmatprep.mubr.msk.f32.mxu0 %vm363_vm0, %v346_v18  ;;  %1864 = vmatpush3.msra.mxu0 %v800_v33 }
  0x26   : > { %1865 = vmatprep.subr.mxu0 %v799_v34 }
  0x27   : > { %1866 = vmatpush3.msra.mxu0 %v799_v34 }
  0x28   : > { %1805 = vmatmul.mubr.msk.f32.gmra.mxu0 %vm363_vm0, %v347_v19 }
  0x29   : > { %1807 = vmatprep.mubr.msk.f32.mxu0 %vm363_vm0, %v348_v20  ;;  %v798_v20 = vld [vmem:[%s2701_s5] sm:$0xff] }
  0x2a   : > { %1867 = vmatprep.subr.mxu0 %v798_v20 }
  0x2b   : > { %1868 = vmatpush3.msra.mxu0 %v798_v20 }
  0x2c   : > { %1808 = vmatmul.mubr.msk.f32.gmra.mxu0 %vm363_vm0, %v349_v21  ;;  %v1029_v21 = vld [vmem:[%s2703_s7 + $0x38] sm:$0xff] }
  0x2d   : > { %1810 = vmatprep.mubr.msk.f32.mxu0 %vm363_vm0, %v350_v22  ;;  %1933 = vmatprep.subr.mxu1 %v1029_v21  ;;  %v1028_v22 = vld [vmem:[%s2703_s7 + $0x30] sm:$0xff] }
  0x2e   : > { %1893 = vmatprep.subr.mxu0 %v1029_v21 }
  0x30   : > { %1811 = vmatmul.mubr.msk.f32.gmra.mxu0 %vm363_vm0, %v351_v23  ;;  %v1027_v23 = vld [vmem:[%s2703_s7 + $0x28] sm:$0xff] }
  0xd4   : > { %v1791_v36 = vpop.f32.mrf.mxu0 }
  0xd5   : > { %v484_v37 = vadd.f32 %v1791_v36, %v1619_v35 }
  0xd6   : > { %v478_v38 = vpop.f32.mrf.mxu0 }
  0xd7   : > { %v479_v39 = vadd.f32 %v1619_v35, %v478_v38  ;;  %v558_v42 = vmax.f32 %v484_v37, 0.0 }
  0xd8   : > { %v1794_v40 = vpop.f32.mrf.mxu0 }
  0xd9   : > { %v557_v41 = vmax.f32 %v479_v39, 0.0  ;;  %v494_v43 = vadd.f32 %v1794_v40, %v1619_v35 }
  0xda   : > { %v488_v44 = vpop.f32.mrf.mxu0 }
  0xdb   : > { %v489_v45 = vadd.f32 %v1619_v35, %v488_v44  ;;  %1829 = vmatprep.mubr.msk.f32.mxu1 %vm588_vm1, %v557_v41  ;;  %v560_v48 = vmax.f32 %v494_v43, 0.0 }
  0xdc   : > { %v1797_v46 = vpop.f32.mrf.mxu0  ;;  %1830 = vmatmul.mubr.msk.f32.vlgmr.msra.gmra.mxu1 %vm588_vm1, %v558_v42 }
  0xdd   : > { %v559_v47 = vmax.f32 %v489_v45, 0.0  ;;  %v504_v49 = vadd.f32 %v1797_v46, %v1619_v35  ;;  %1941 = vmatpush3.msra.mxu1 %v1029_v21 }
  0xde   : > { %v498_v50 = vpop.f32.mrf.mxu0  ;;  %1934 = vmatprep.subr.mxu1 %v1028_v22 }
  0xdf   : > { %v499_v51 = vadd.f32 %v1619_v35, %v498_v50  ;;  %1832 = vmatprep.mubr.msk.f32.mxu1 %vm588_vm1, %v559_v47  ;;  %v562_v54 = vmax.f32 %v504_v49, 0.0  ;;  %1942 = vmatpush3.msra.mxu1 %v1028_v22 }
  0xe0   : > { %v1800_v52 = vpop.f32.mrf.mxu0  ;;  %1833 = vmatmul.mubr.msk.f32.gmra.mxu1 %vm588_vm1, %v560_v48  ;;  %1935 = vmatprep.subr.mxu1 %v1027_v23 }
  0xe1   : > { %v561_v53 = vmax.f32 %v499_v51, 0.0  ;;  %v514_v55 = vadd.f32 %v1800_v52, %v1619_v35  ;;  %1943 = vmatpush3.msra.mxu1 %v1027_v23 }
  0xe2   : > { %v508_v56 = vpop.f32.mrf.mxu0  ;;  %1936 = vmatprep.subr.mxu1 %v1026_v24 }
  0xe3   : > { %v509_v57 = vadd.f32 %v1619_v35, %v508_v56  ;;  %1835 = vmatprep.mubr.msk.f32.mxu1 %vm588_vm1, %v561_v53  ;;  %v564_v60 = vmax.f32 %v514_v55, 0.0  ;;  %1944 = vmatpush3.msra.mxu1 %v1026_v24 }
  0xe4   : > { %v1803_v58 = vpop.f32.mrf.mxu0  ;;  %1836 = vmatmul.mubr.msk.f32.gmra.mxu1 %vm588_vm1, %v562_v54  ;;  %1937 = vmatprep.subr.mxu1 %v1025_v25 }
  0xe5   : > { %v563_v59 = vmax.f32 %v509_v57, 0.0  ;;  %v524_v61 = vadd.f32 %v1803_v58, %v1619_v35  ;;  %1945 = vmatpush3.msra.mxu1 %v1025_v25 }
  0xe6   : > { %v518_v62 = vpop.f32.mrf.mxu0  ;;  %1938 = vmatprep.subr.mxu1 %v1024_v26 }
  0xe7   : > { %v519_v63 = vadd.f32 %v1619_v35, %v518_v62  ;;  %1838 = vmatprep.mubr.msk.f32.mxu1 %vm588_vm1, %v563_v59  ;;  %v566_v2 = vmax.f32 %v524_v61, 0.0  ;;  %1946 = vmatpush3.msra.mxu1 %v1024_v26 }
  0xe8   : > { %v1806_v0 = vpop.f32.mrf.mxu0  ;;  %1839 = vmatmul.mubr.msk.f32.gmra.mxu1 %vm588_vm1, %v564_v60 }
  0xe9   : > { %v565_v1 = vmax.f32 %v519_v63, 0.0  ;;  %v534_v3 = vadd.f32 %v1806_v0, %v1619_v35 }
  0xea   : > { %v528_v4 = vpop.f32.mrf.mxu0 }
  0xeb   : > { %v529_v5 = vadd.f32 %v1619_v35, %v528_v4  ;;  %1841 = vmatprep.mubr.msk.f32.mxu1 %vm588_vm1, %v565_v1  ;;  %v568_v8 = vmax.f32 %v534_v3, 0.0 }
  0xec   : > { %v1809_v6 = vpop.f32.mrf.mxu0  ;;  %1842 = vmatmul.mubr.msk.f32.gmra.mxu1 %vm588_vm1, %v566_v2 }
  0xed   : > { %v567_v7 = vmax.f32 %v529_v5, 0.0  ;;  %v544_v9 = vadd.f32 %v1809_v6, %v1619_v35 }
  0xee   : > { %v538_v10 = vpop.f32.mrf.mxu0 }
  0xef   : > { %v539_v11 = vadd.f32 %v1619_v35, %v538_v10  ;;  %1844 = vmatprep.mubr.msk.f32.mxu1 %vm588_vm1, %v567_v7  ;;  %v570_v14 = vmax.f32 %v544_v9, 0.0 }
  0xf0   : > { %v1812_v12 = vpop.f32.mrf.mxu0  ;;  %1845 = vmatmul.mubr.msk.f32.gmra.mxu1 %vm588_vm1, %v568_v8 }
  0xf1   : > { %v569_v13 = vmax.f32 %v539_v11, 0.0  ;;  %v554_v15 = vadd.f32 %v1812_v12, %v1619_v35  ;;  %v1023_v12 = vld [vmem:[%s2703_s7 + $0x8] sm:$0xff] }
  0xf2   : > { %v548_v16 = vpop.f32.mrf.mxu0  ;;  %1939 = vmatprep.subr.mxu1 %v1023_v12 }
  0xf3   : > { %v549_v17 = vadd.f32 %v1619_v35, %v548_v16  ;;  %1847 = vmatprep.mubr.msk.f32.mxu1 %vm588_vm1, %v569_v13  ;;  %v572_v19 = vmax.f32 %v554_v15, 0.0  ;;  %1947 = vmatpush3.msra.mxu1 %v1023_v12  ;;  %v1022_v13 = vld [vmem:[%s2703_s7] sm:$0xff] }
  0xf4   : > { %1848 = vmatmul.mubr.msk.f32.gmra.mxu1 %vm588_vm1, %v570_v14  ;;  %1940 = vmatprep.subr.mxu1 %v1022_v13  ;;  %v1653_v14 = vld [vmem:[%s2702_s6] ss:$0 sm:$0xff] }
  0xf5   : > { %v571_v18 = vmax.f32 %v549_v17, 0.0  ;;  %1948 = vmatpush3.msra.mxu1 %v1022_v13 }
  0xf7   : > { %1850 = vmatprep.mubr.msk.f32.mxu1 %vm588_vm1, %v571_v18 }
  0xf8   : > { %1851 = vmatmul.mubr.msk.f32.gmra.mxu1 %vm588_vm1, %v572_v19 }
 0x19c   : > { %v1831_v28 = vpop.f32.mrf.mxu1 }
 0x19d   : > { %v709_v29 = vadd.f32 %v1831_v28, %v2261_v27 }
 0x19e   : > { %v703_v30 = vpop.f32.mrf.mxu1 }
 0x19f   : > { %v704_v31 = vadd.f32 %v2261_v27, %v703_v30  ;;  %v783_v34 = vmax.f32 %v709_v29, 0.0 }
 0x1a0   : > { %v1834_v32 = vpop.f32.mrf.mxu1 }
 0x1a1   : > { %v782_v33 = vmax.f32 %v704_v31, 0.0  ;;  %v719_v35 = vadd.f32 %v1834_v32, %v2261_v27 }
 0x1a2   : > { %v713_v36 = vpop.f32.mrf.mxu1 }
 0x1a3   : > { %v714_v37 = vadd.f32 %v2261_v27, %v713_v36  ;;  %1869 = vmatprep.mubr.msk.f32.mxu0 %vm588_vm1, %v782_v33  ;;  %v785_v40 = vmax.f32 %v719_v35, 0.0 }
 0x1a4   : > { %v1837_v38 = vpop.f32.mrf.mxu1  ;;  %1870 = vmatmul.mubr.msk.f32.vlgmr.msra.gmra.mxu0 %vm588_vm1, %v783_v34 }
 0x1a5   : > { %v784_v39 = vmax.f32 %v714_v37, 0.0  ;;  %1894 = vmatpush3.msra.mxu0 %v1029_v21  ;;  %v729_v41 = vadd.f32 %v1837_v38, %v2261_v27 }
 0x1a6   : > { %v723_v42 = vpop.f32.mrf.mxu1  ;;  %1895 = vmatprep.subr.mxu0 %v1028_v22 }
 0x1a7   : > { %v724_v43 = vadd.f32 %v2261_v27, %v723_v42  ;;  %1872 = vmatprep.mubr.msk.f32.mxu0 %vm588_vm1, %v784_v39  ;;  %1896 = vmatpush3.msra.mxu0 %v1028_v22  ;;  %v787_v46 = vmax.f32 %v729_v41, 0.0 }
 0x1a8   : > { %v1840_v44 = vpop.f32.mrf.mxu1  ;;  %1873 = vmatmul.mubr.msk.f32.gmra.mxu0 %vm588_vm1, %v785_v40  ;;  %1897 = vmatprep.subr.mxu0 %v1027_v23 }
 0x1a9   : > { %v786_v45 = vmax.f32 %v724_v43, 0.0  ;;  %1898 = vmatpush3.msra.mxu0 %v1027_v23  ;;  %v739_v47 = vadd.f32 %v1840_v44, %v2261_v27 }
 0x1aa   : > { %v733_v48 = vpop.f32.mrf.mxu1  ;;  %1899 = vmatprep.subr.mxu0 %v1026_v24 }
 0x1ab   : > { %v734_v49 = vadd.f32 %v2261_v27, %v733_v48  ;;  %1875 = vmatprep.mubr.msk.f32.mxu0 %vm588_vm1, %v786_v45  ;;  %1900 = vmatpush3.msra.mxu0 %v1026_v24  ;;  %v789_v52 = vmax.f32 %v739_v47, 0.0 }
 0x1ac   : > { %v1843_v50 = vpop.f32.mrf.mxu1  ;;  %1876 = vmatmul.mubr.msk.f32.gmra.mxu0 %vm588_vm1, %v787_v46  ;;  %1901 = vmatprep.subr.mxu0 %v1025_v25 }
 0x1ad   : > { %v788_v51 = vmax.f32 %v734_v49, 0.0  ;;  %1902 = vmatpush3.msra.mxu0 %v1025_v25  ;;  %v749_v53 = vadd.f32 %v1843_v50, %v2261_v27 }
 0x1ae   : > { %v743_v54 = vpop.f32.mrf.mxu1  ;;  %1903 = vmatprep.subr.mxu0 %v1024_v26 }
 0x1af   : > { %v744_v55 = vadd.f32 %v2261_v27, %v743_v54  ;;  %1878 = vmatprep.mubr.msk.f32.mxu0 %vm588_vm1, %v788_v51  ;;  %1904 = vmatpush3.msra.mxu0 %v1024_v26  ;;  %v791_v58 = vmax.f32 %v749_v53, 0.0 }
 0x1b0   : > { %v1846_v56 = vpop.f32.mrf.mxu1  ;;  %1879 = vmatmul.mubr.msk.f32.gmra.mxu0 %vm588_vm1, %v789_v52  ;;  %1905 = vmatprep.subr.mxu0 %v1023_v12 }
 0x1b1   : > { %v790_v57 = vmax.f32 %v744_v55, 0.0  ;;  %v759_v59 = vadd.f32 %v1846_v56, %v2261_v27  ;;  %1906 = vmatpush3.msra.mxu0 %v1023_v12 }
 0x1b2   : > { %v753_v60 = vpop.f32.mrf.mxu1  ;;  %1907 = vmatprep.subr.mxu0 %v1022_v13 }
 0x1b3   : > { %v754_v61 = vadd.f32 %v2261_v27, %v753_v60  ;;  %1881 = vmatprep.mubr.msk.f32.mxu0 %vm588_vm1, %v790_v57  ;;  %v793_v0 = vmax.f32 %v759_v59, 0.0  ;;  %1908 = vmatpush3.msra.mxu0 %v1022_v13 }
 0x1b4   : > { %v1849_v62 = vpop.f32.mrf.mxu1  ;;  %1882 = vmatmul.mubr.msk.f32.gmra.mxu0 %vm588_vm1, %v791_v58 }
 0x1b5   : > { %v792_v63 = vmax.f32 %v754_v61, 0.0  ;;  %v769_v1 = vadd.f32 %v1849_v62, %v2261_v27 }
 0x1b6   : > { %v763_v2 = vpop.f32.mrf.mxu1 }
 0x1b7   : > { %v764_v3 = vadd.f32 %v2261_v27, %v763_v2  ;;  %1884 = vmatprep.mubr.msk.f32.mxu0 %vm588_vm1, %v792_v63  ;;  %v795_v6 = vmax.f32 %v769_v1, 0.0  ;;  %v2323_v63 = vld [vmem:[%s2704_s8] ss:$0 sm:$0xff] }
 0x1b8   : > { %v1852_v4 = vpop.f32.mrf.mxu1  ;;  %1885 = vmatmul.mubr.msk.f32.gmra.mxu0 %vm588_vm1, %v793_v0 }
 0x1b9   : > { %v794_v5 = vmax.f32 %v764_v3, 0.0  ;;  %v779_v7 = vadd.f32 %v1852_v4, %v2261_v27 }
 0x1ba   : > { %v773_v8 = vpop.f32.mrf.mxu1 }
 0x1bb   : > { %v774_v9 = vadd.f32 %v2261_v27, %v773_v8  ;;  %1887 = vmatprep.mubr.msk.f32.mxu0 %vm588_vm1, %v794_v5  ;;  %v797_v11 = vmax.f32 %v779_v7, 0.0 }
 0x1bc   : > { %1888 = vmatmul.mubr.msk.f32.gmra.mxu0 %vm588_vm1, %v795_v6 }
 0x1bd   : > { %v796_v10 = vmax.f32 %v774_v9, 0.0 }
 0x1bf   : > { %1890 = vmatprep.mubr.msk.f32.mxu0 %vm588_vm1, %v796_v10 }
 0x1c0   : > { %1891 = vmatmul.mubr.msk.f32.gmra.mxu0 %vm588_vm1, %v797_v11 }
 0x264   : > { %v1871_v15 = vpop.f32.mrf.mxu0 }
 0x265   : > { %v933_v16 = vadd.f32 %v1871_v15, %v1653_v14 }
 0x266   : > { %v927_v17 = vpop.f32.mrf.mxu0 }
 0x267   : > { %v928_v18 = vadd.f32 %v1653_v14, %v927_v17  ;;  %v1007_v21 = vmax.f32 %v933_v16, 0.0 }
 0x268   : > { %v1874_v19 = vpop.f32.mrf.mxu0 }
 0x269   : > { %v1006_v20 = vmax.f32 %v928_v18, 0.0  ;;  %v943_v22 = vadd.f32 %v1874_v19, %v1653_v14 }
 0x26a   : > { %v937_v23 = vpop.f32.mrf.mxu0 }
 0x26b   : > { %v938_v24 = vadd.f32 %v1653_v14, %v937_v23  ;;  %1909 = vmatprep.mubr.msk.f32.mxu0 %vm588_vm1, %v1006_v20  ;;  %v1009_v27 = vmax.f32 %v943_v22, 0.0 }
 0x26c   : > { %v1877_v25 = vpop.f32.mrf.mxu0  ;;  %1910 = vmatmul.mubr.msk.f32.vlgmr.msra.gmra.mxu0 %vm588_vm1, %v1007_v21 }
 0x26d   : > { %v1008_v26 = vmax.f32 %v938_v24, 0.0  ;;  %v953_v28 = vadd.f32 %v1877_v25, %v1653_v14 }
 0x26e   : > { %v947_v29 = vpop.f32.mrf.mxu0 }
 0x26f   : > { %v948_v30 = vadd.f32 %v1653_v14, %v947_v29  ;;  %1912 = vmatprep.mubr.msk.f32.mxu1 %vm588_vm1, %v1008_v26  ;;  %v1011_v33 = vmax.f32 %v953_v28, 0.0 }
 0x270   : > { %v1880_v31 = vpop.f32.mrf.mxu0  ;;  %1913 = vmatmul.mubr.msk.f32.vlgmr.msra.gmra.mxu1 %vm588_vm1, %v1009_v27 }
 0x271   : > { %v1010_v32 = vmax.f32 %v948_v30, 0.0  ;;  %v963_v34 = vadd.f32 %v1880_v31, %v1653_v14 }
 0x272   : > { %v957_v35 = vpop.f32.mrf.mxu0 }
 0x273   : > { %v958_v36 = vadd.f32 %v1653_v14, %v957_v35  ;;  %1915 = vmatprep.mubr.msk.f32.mxu1 %vm588_vm1, %v1010_v32  ;;  %v1013_v39 = vmax.f32 %v963_v34, 0.0 }
 0x274   : > { %v1883_v37 = vpop.f32.mrf.mxu0  ;;  %1916 = vmatmul.mubr.msk.f32.gmra.mxu1 %vm588_vm1, %v1011_v33 }
 0x275   : > { %v1012_v38 = vmax.f32 %v958_v36, 0.0  ;;  %v973_v40 = vadd.f32 %v1883_v37, %v1653_v14 }
 0x276   : > { %v967_v41 = vpop.f32.mrf.mxu0 }
 0x277   : > { %v968_v42 = vadd.f32 %v1653_v14, %v967_v41  ;;  %1918 = vmatprep.mubr.msk.f32.mxu1 %vm588_vm1, %v1012_v38  ;;  %v1015_v45 = vmax.f32 %v973_v40, 0.0 }
 0x278   : > { %v1886_v43 = vpop.f32.mrf.mxu0  ;;  %1919 = vmatmul.mubr.msk.f32.gmra.mxu1 %vm588_vm1, %v1013_v39 }
 0x279   : > { %v1014_v44 = vmax.f32 %v968_v42, 0.0  ;;  %v983_v46 = vadd.f32 %v1886_v43, %v1653_v14 }
 0x27a   : > { %v977_v47 = vpop.f32.mrf.mxu0 }
 0x27b   : > { %v978_v48 = vadd.f32 %v1653_v14, %v977_v47  ;;  %1921 = vmatprep.mubr.msk.f32.mxu1 %vm588_vm1, %v1014_v44  ;;  %v1017_v51 = vmax.f32 %v983_v46, 0.0  ;;  %v1518_v47 = vlaneseq }
 0x27c   : > { %v1889_v49 = vpop.f32.mrf.mxu0  ;;  %1922 = vmatmul.mubr.msk.f32.gmra.mxu1 %vm588_vm1, %v1015_v45 }
 0x27d   : > { %v1016_v50 = vmax.f32 %v978_v48, 0.0  ;;  %v993_v52 = vadd.f32 %v1889_v49, %v1653_v14 }
 0x27e   : > { %v987_v53 = vpop.f32.mrf.mxu0 }
 0x27f   : > { %v988_v54 = vadd.f32 %v1653_v14, %v987_v53  ;;  %1924 = vmatprep.mubr.msk.f32.mxu1 %vm588_vm1, %v1016_v50  ;;  %v1019_v57 = vmax.f32 %v993_v52, 0.0 }
 0x280   : > { %v1892_v55 = vpop.f32.mrf.mxu0  ;;  %1925 = vmatmul.mubr.msk.f32.gmra.mxu1 %vm588_vm1, %v1017_v51 }
 0x281   : > { %v1018_v56 = vmax.f32 %v988_v54, 0.0  ;;  %v1003_v58 = vadd.f32 %v1892_v55, %v1653_v14 }
 0x282   : > { %v997_v59 = vpop.f32.mrf.mxu0 }
 0x283   : > { %v998_v60 = vadd.f32 %v1653_v14, %v997_v59  ;;  %1927 = vmatprep.mubr.msk.f32.mxu1 %vm588_vm1, %v1018_v56  ;;  %v1021_v62 = vmax.f32 %v1003_v58, 0.0  ;;  %v2383_v56 = vand.u32 127, %v1518_v47 }
 0x284   : > { %1928 = vmatmul.mubr.msk.f32.gmra.mxu1 %vm588_vm1, %v1019_v57 }
 0x285   : > { %v1020_v61 = vmax.f32 %v998_v60, 0.0  ;;  %vm1520_vm3 = vcmp.lt.s32.totalorder %v2383_v56, 8 }
 0x287   : > { %1930 = vmatprep.mubr.msk.f32.mxu1 %vm588_vm1, %v1020_v61 }
 0x288   : > { %1931 = vmatmul.mubr.msk.f32.gmra.mxu1 %vm588_vm1, %v1021_v62 }
 0x32c   : > { %v1911_v0 = vpop.f32.mrf.mxu0 }
 0x32d   : > { %v2326_v1 = vadd.f32 %v1911_v0, %v2323_v63 }
 0x32e   : > { %v1151_v2 = vpop.f32.mrf.mxu0 }
 0x32f   : > { %v1247_v3 = vand.u32 2147483647, %v2326_v1  ;;  %v2330_v4 = vadd.f32 %v2323_v63, %v1151_v2  ;;  %v1455_v55 = vmax.f32 %v2326_v1, 0.0  ;;  %vm1487_vm4 = vcmp.gt.f32.partialorder %v2326_v1, 20.0 }
 0x330   : > { %v1914_v5 = vpop.f32.mrf.mxu1 }
 0x331   : > { %v1263_v6 = vsub.f32 0.0, %v1247_v3  ;;  %v2333_v7 = vadd.f32 %v1914_v5, %v2323_v63  ;;  %v1246_v8 = vand.u32 2147483647, %v2330_v4  ;;  %v1454_v59 = vmax.f32 %v2330_v4, 0.0 }
 0x332   : > { %v1161_v9 = vpop.f32.mrf.mxu1  ;;  %vm1486_vm7 = vcmp.gt.f32.partialorder %v2330_v4, 20.0 }
 0x333   : > { %v1280_v10 = vmul.f32 1.442695, %v1263_v6  ;;  %v1249_v11 = vand.u32 2147483647, %v2333_v7  ;;  %v1262_v12 = vsub.f32 0.0, %v1246_v8  ;;  %v2338_v13 = vadd.f32 %v2323_v63, %v1161_v9 }
 0x334   : > { %v1917_v14 = vpop.f32.mrf.mxu1  ;;  %v1457_v60 = vmax.f32 %v2333_v7, 0.0  ;;  %vm1489_vm9 = vcmp.gt.f32.partialorder %v2333_v7, 20.0 }
 0x335   : > { %1957 = vpow2.f32 %v1280_v10  ;;  %v1265_v15 = vsub.f32 0.0, %v1249_v11  ;;  %v2341_v16 = vadd.f32 %v1917_v14, %v2323_v63  ;;  %v1278_v17 = vmul.f32 1.442695, %v1262_v12 }
 0x336   : > { %v1248_v18 = vand.u32 2147483647, %v2338_v13  ;;  %v1171_v19 = vpop.f32.mrf.mxu1  ;;  %v1456_v2 = vmax.f32 %v2338_v13, 0.0  ;;  %vm1488_vm12 = vcmp.gt.f32.partialorder %v2338_v13, 20.0 }
 0x337   : > { %v1284_v20 = vmul.f32 1.442695, %v1265_v15  ;;  %v1251_v21 = vand.u32 2147483647, %v2341_v16  ;;  %1959 = vpow2.f32 %v1278_v17  ;;  %v2346_v25 = vadd.f32 %v2323_v63, %v1171_v19 }
 0x338   : > { %v1264_v22 = vsub.f32 0.0, %v1248_v18  ;;  %v1920_v23 = vpop.f32.mrf.mxu1  ;;  %v1459_v15 = vmax.f32 %v2341_v16, 0.0  ;;  %vm1491_vm13 = vcmp.gt.f32.partialorder %v2341_v16, 20.0 }
 0x339   : > { %1961 = vpow2.f32 %v1284_v20  ;;  %v1267_v24 = vsub.f32 0.0, %v1251_v21  ;;  %v2349_v26 = vadd.f32 %v1920_v23, %v2323_v63  ;;  %v1250_v30 = vand.u32 2147483647, %v2346_v25 }
 0x33a   : > { %v1282_v27 = vmul.f32 1.442695, %v1264_v22  ;;  %v1181_v28 = vpop.f32.mrf.mxu1  ;;  %1963 = vtanh.f32 %v2326_v1  ;;  %v1458_v18 = vmax.f32 %v2346_v25, 0.0  ;;  %vm1490_vm15 = vcmp.gt.f32.partialorder %v2346_v25, 20.0 }
 0x33b   : > { %v1288_v29 = vmul.f32 1.442695, %v1267_v24  ;;  %v1253_v31 = vand.u32 2147483647, %v2349_v26  ;;  %v1266_v33 = vsub.f32 0.0, %v1250_v30  ;;  %v2355_v34 = vadd.f32 %v2323_v63, %v1181_v28 }
 0x33c   : > { %1965 = vpow2.f32 %v1282_v27  ;;  %v1923_v32 = vpop.f32.mrf.mxu1  ;;  %v1461_v19 = vmax.f32 %v2349_v26, 0.0  ;;  %vm1493_vm1 = vcmp.gt.f32.partialorder %v2349_v26, 20.0 }
 0x33d   : > { %1967 = vpow2.f32 %v1288_v29  ;;  %v1269_v35 = vsub.f32 0.0, %v1253_v31  ;;  %v2359_v36 = vadd.f32 %v1923_v32, %v2323_v63  ;;  %v1286_v38 = vmul.f32 1.442695, %v1266_v33 }
 0x33e   : > { %1969 = vtanh.f32 %v2330_v4  ;;  %v1191_v37 = vpop.f32.mrf.mxu1  ;;  %v1252_v39 = vand.u32 2147483647, %v2355_v34 }
 0x33f   : > { %1971 = vtanh.f32 %v2333_v7  ;;  %v1292_v40 = vmul.f32 1.442695, %v1269_v35  ;;  %v1255_v43 = vand.u32 2147483647, %v2359_v36  ;;  %v2368_v44 = vadd.f32 %v2323_v63, %v1191_v37 }
 0x340   : > { %1973 = vtanh.f32 %v2338_v13  ;;  %v1268_v41 = vsub.f32 0.0, %v1252_v39  ;;  %v1926_v45 = vpop.f32.mrf.mxu1 }
 0x341   : > { %1975 = vpow2.f32 %v1286_v38  ;;  %v1254_v49 = vand.u32 2147483647, %v2368_v44  ;;  %v2377_v51 = vadd.f32 %v1926_v45, %v2323_v63  ;;  %v1271_v54 = vsub.f32 0.0, %v1255_v43 }
 0x342   : > { %v2364_v42 = vpop.eup %1957  ;;  %1977 = vpow2.f32 %v1292_v40  ;;  %v1290_v48 = vmul.f32 1.442695, %v1268_v41  ;;  %v1201_v38 = vpop.f32.mrf.mxu1 }
 0x343   : > { %v1319_v46 = vadd.f32 1.0, %v2364_v42  ;;  %1979 = vtanh.f32 %v2341_v16  ;;  %v1270_v61 = vsub.f32 0.0, %v1254_v49  ;;  %v1322_v0 = vmul.f32 -0.5, %v2364_v42 }
 0x344   : > { %1981 = vtanh.f32 %v2346_v25  ;;  %v2374_v50 = vpop.eup %1959  ;;  %v1257_v3 = vand.u32 2147483647, %v2377_v51  ;;  %v1325_v6 = vand.u32 2147483647, %v2364_v42  ;;  %v1296_v10 = vmul.f32 1.442695, %v1271_v54 }
 0x345   : > { %1983 = vlog2.f32 %v1319_v46  ;;  %v1310_v53 = vadd.f32 1.0, %v2374_v50  ;;  %v1313_v8 = vmul.f32 -0.5, %v2374_v50  ;;  %v1294_v20 = vmul.f32 1.442695, %v1270_v61 }
 0x346   : > { %v2379_v52 = vpop.eup %1961  ;;  %1985 = vpow2.f32 %v1290_v48  ;;  %v1323_v22 = vadd.f32 1.0, %v1322_v0  ;;  %v1316_v23 = vand.u32 2147483647, %v2374_v50  ;;  %v1273_v24 = vsub.f32 0.0, %v1257_v3 }
 0x347   : > { %v1337_v57 = vadd.f32 1.0, %v2379_v52  ;;  %1987 = vtanh.f32 %v2349_v26  ;;  %v2387_v58 = vpop.eup %1963  ;;  %v1340_v12 = vmul.f32 -0.5, %v2379_v52  ;;  %vm2416_vm2 = vcmp.lt.f32.partialorder %v1325_v6, 0.0004427343 }
 0x348   : > { %1989 = vlog2.f32 %v1310_v53  ;;  %v1314_v29 = vadd.f32 1.0, %v1313_v8  ;;  %v1343_v30 = vand.u32 2147483647, %v2379_v52  ;;  %v1324_v46 = vmul.f32 %v2364_v42, %v1323_v22 }
 0x349   : > { %v2391_v62 = vpop.eup %1965  ;;  %1991 = vlog2.f32 %v1337_v57  ;;  %v1341_v32 = vadd.f32 1.0, %v1340_v12  ;;  %vm2436_vm6 = vcmp.lt.f32.partialorder %v1316_v23, 0.0004427343  ;;  %v1300_v48 = vmul.f32 1.442695, %v1273_v24 }
 0x34a   : > { %v2396_v5 = vpop.eup %1967  ;;  %v1328_v9 = vadd.f32 1.0, %v2391_v62  ;;  %1993 = vtanh.f32 %v2355_v34  ;;  %v1331_v33 = vmul.f32 -0.5, %v2391_v62  ;;  %v1334_v40 = vand.u32 2147483647, %v2391_v62 }
 0x34b   : > { %v2401_v11 = vpop.eup %1969  ;;  %v1355_v14 = vadd.f32 1.0, %v2396_v5  ;;  %v1358_v35 = vmul.f32 -0.5, %v2396_v5  ;;  %v1361_v41 = vand.u32 2147483647, %v2396_v5  ;;  %v1315_v53 = vmul.f32 %v2374_v50, %v1314_v29 }
 0x34c   : > { %v2407_v17 = vpop.eup %1971  ;;  %1995 = vlog2.f32 %v1328_v9  ;;  %vm2442_vm8 = vcmp.lt.f32.partialorder %v1343_v30, 0.0004427343  ;;  %v2447_v57 = vadd.f32 %v2323_v63, %v1201_v38  ;;  %v1342_v0 = vmul.f32 %v2379_v52, %v1341_v32 }
 0x34d   : > { %v2411_v21 = vpop.eup %1973  ;;  %1997 = vlog2.f32 %v1355_v14  ;;  %v1332_v3 = vadd.f32 1.0, %v1331_v33  ;;  %v1359_v6 = vadd.f32 1.0, %v1358_v35  ;;  %vm2455_vm10 = vcmp.lt.f32.partialorder %v1334_v40, 0.0004427343 }
 0x34e   : > { %v2414_v27 = vpop.eup %1975  ;;  %1999 = vpow2.f32 %v1296_v10  ;;  %vm2459_vm11 = vcmp.lt.f32.partialorder %v1361_v41, 0.0004427343  ;;  %v1256_v22 = vand.u32 2147483647, %v2447_v57 }
 0x34f   : > { %v2422_v31 = vpop.eup %1977  ;;  %v1346_v37 = vadd.f32 1.0, %v2414_v27  ;;  %2001 = vpow2.f32 %v1294_v20  ;;  %v1349_v10 = vmul.f32 -0.5, %v2414_v27  ;;  %v1352_v20 = vand.u32 2147483647, %v2414_v27 }
 0x350   : > { %v2428_v39 = vpop.eup %1979  ;;  %v1373_v43 = vadd.f32 1.0, %v2422_v31  ;;  %v1376_v30 = vmul.f32 -0.5, %v2422_v31  ;;  %v1333_v32 = vmul.f32 %v2391_v62, %v1332_v3  ;;  %v1360_v33 = vmul.f32 %v2396_v5, %v1359_v6 }
 0x351   : > { %v2433_v45 = vpop.eup %1981  ;;  %2003 = vlog2.f32 %v1346_v37  ;;  %v1350_v40 = vadd.f32 1.0, %v1349_v10  ;;  %v1379_v41 = vand.u32 2147483647, %v2422_v31  ;;  %vm2502_vm14 = vcmp.lt.f32.partialorder %v1352_v20, 0.0004427343 }
 0x352   : > { %v1984_v49 = vpop.eup %1983  ;;  %2005 = vlog2.f32 %v1373_v43 }
 0x353   : > { %v2449_v42 = vpop.eup %1985  ;;  %v1321_v61 = vmul.f32 0.6931472, %v1984_v49  ;;  %2007 = vpow2.f32 %v1300_v48  ;;  %vm2533_vm0 = vcmp.lt.f32.partialorder %v1379_v41, 0.0004427343 }
 0x354   : > { %v2453_v50 = vpop.eup %1987  ;;  %v1364_v12 = vadd.f32 1.0, %v2449_v42 }
 0x355   : > { %v1990_v52 = vpop.eup %1989  ;;  %v1327_v14 = vsel %vm2416_vm2, %v1324_v46, %v1321_v61 }
 0x356   : > { %v1992_v23 = vpop.eup %1991  ;;  %v1471_v24 = vadd.f32 %v1455_v55, %v1327_v14  ;;  %v1312_v29 = vmul.f32 0.6931472, %v1990_v52  ;;  %2009 = vlog2.f32 %v1364_v12  ;;  %v1272_v55 = vsub.f32 0.0, %v1256_v22 }
 0x357   : > { %v1339_v28 = vmul.f32 0.6931472, %v1992_v23  ;;  %v2483_v35 = vpop.eup %1993 }
 0x358   : > { %v1503_v37 = vsel %vm1487_vm4, %v2326_v1, %v1471_v24  ;;  %v1318_v38 = vsel %vm2436_vm6, %v1315_v53, %v1312_v29  ;;  %v1298_v48 = vmul.f32 1.442695, %v1272_v55  ;;  %v1351_v24 = vmul.f32 %v2414_v27, %v1350_v40 }
 0x359   : > { %v1996_v43 = vpop.eup %1995  ;;  %v1522_v62 = vsel %vm1520_vm3, %v2387_v58, %v1503_v37  ;;  %v1470_v5 = vadd.f32 %v1454_v59, %v1318_v38  ;;  %v1345_v46 = vsel %vm2442_vm8, %v1342_v0, %v1339_v28  ;;  %v1377_v58 = vadd.f32 1.0, %v1376_v30 }
 0x35a   : > { %v1998_v49 = vpop.eup %1997  ;;  %1539 = vst.msk [vmem:[%s2478_s28 + $0x8] sm:$0xff] %vm1537_vm5, %v1522_v62  ;;  %v1473_v1 = vadd.f32 %v1457_v60, %v1345_v46  ;;  %v1330_v47 = vmul.f32 0.6931472, %v1996_v43  ;;  %v1367_v0 = vmul.f32 -0.5, %v2449_v42  ;;  %2011 = vpow2.f32 %v1298_v48  ;;  %v1929_v60 = vpop.f32.mrf.mxu1 }
 0x35b   : > { %v2506_v61 = vpop.eup %1999  ;;  %v1502_v59 = vsel %vm1486_vm7, %v2330_v4, %v1470_v5  ;;  %v1357_v54 = vmul.f32 0.6931472, %v1998_v49  ;;  %v2543_v22 = vadd.f32 %v1929_v60, %v2323_v63  ;;  %v1378_v29 = vmul.f32 %v2422_v31, %v1377_v58 }
 0x35c   : > { %v1521_v3 = vsel %vm1520_vm3, %v2401_v11, %v1502_v59  ;;  %v1505_v6 = vsel %vm1489_vm9, %v2333_v7, %v1473_v1  ;;  %v1336_v10 = vsel %vm2455_vm10, %v1333_v32, %v1330_v47  ;;  %v1391_v4 = vadd.f32 1.0, %v2506_v61  ;;  %v2522_v12 = vpop.eup %2001 }
 0x35d   : > { %1538 = vst.msk [vmem:[%s2478_s28] sm:$0xff] %vm1537_vm5, %v1521_v3  ;;  %v1524_v52 = vsel %vm1520_vm3, %v2407_v17, %v1505_v6  ;;  %v1472_v11 = vadd.f32 %v1456_v2, %v1336_v10  ;;  %v1363_v14 = vsel %vm2459_vm11, %v1360_v33, %v1357_v54  ;;  %v1382_v17 = vadd.f32 1.0, %v2522_v12  ;;  %v1211_v33 = vpop.f32.mrf.mxu1 }
 0x35e   : > { %v2004_v8 = vpop.eup %2003  ;;  %1541 = vst.msk [vmem:[%s2478_s28 + $0x18] sm:$0xff] %vm1537_vm5, %v1524_v52  ;;  %v1475_v20 = vadd.f32 %v1459_v15, %v1363_v14  ;;  %2013 = vlog2.f32 %v1391_v4  ;;  %v1368_v32 = vadd.f32 1.0, %v1367_v0  ;;  %v1370_v31 = vand.u32 2147483647, %v2449_v42 }
 0x35f   : > { %v2006_v2 = vpop.eup %2005  ;;  %v1504_v9 = vsel %vm1488_vm12, %v2338_v13, %v1472_v11  ;;  %v1348_v23 = vmul.f32 0.6931472, %v2004_v8  ;;  %2015 = vlog2.f32 %v1382_v17  ;;  %v1460_v40 = vmax.f32 %v2355_v34, 0.0  ;;  %v1932_v46 = vpop.f32.mrf.mxu1 }
 0x360   : > { %v1523_v15 = vsel %vm1520_vm3, %v2411_v21, %v1504_v9  ;;  %v1507_v30 = vsel %vm1491_vm13, %v2341_v16, %v1475_v20  ;;  %v1375_v28 = vmul.f32 0.6931472, %v2006_v2  ;;  %v2564_v21 = vpop.eup %2007  ;;  %2017 = vtanh.f32 %v2359_v36 }
 0x361   : > { %1540 = vst.msk [vmem:[%s2478_s28 + $0x10] sm:$0xff] %vm1537_vm5, %v1523_v15  ;;  %v1526_v13 = vsel %vm1520_vm3, %v2428_v39, %v1507_v30  ;;  %v1354_v27 = vsel %vm2502_vm14, %v1351_v24, %v1348_v23  ;;  %v1259_v39 = vand.u32 2147483647, %v2543_v22  ;;  %v1409_v41 = vadd.f32 1.0, %v2564_v21  ;;  %v1221_v54 = vpop.f32.mrf.mxu1 }
 0x362   : > { %1543 = vst.msk [vmem:[%s2478_s28 + $0x28] sm:$0xff] %vm1537_vm5, %v1526_v13  ;;  %v1474_v16 = vadd.f32 %v1458_v18, %v1354_v27  ;;  %v1381_v55 = vsel %vm2533_vm0, %v1378_v29, %v1375_v28  ;;  %v1369_v62 = vmul.f32 %v2449_v42, %v1368_v32  ;;  %v1394_v5 = vmul.f32 -0.5, %v2506_v61 }
 0x363   : > { %v2010_v37 = vpop.eup %2009  ;;  %v1477_v38 = vadd.f32 %v1461_v19, %v1381_v55  ;;  %vm1371_vm2 = vcmp.lt.f32.partialorder %v1370_v31, 0.0004427343  ;;  %2019 = vlog2.f32 %v1409_v41  ;;  %v1385_v42 = vmul.f32 -0.5, %v2522_v12 }
 0x364   : > { %v1506_v18 = vsel %vm1490_vm15, %v2346_v25, %v1474_v16  ;;  %v1366_v43 = vmul.f32 0.6931472, %v2010_v37  ;;  %v1275_v1 = vsub.f32 0.0, %v1259_v39  ;;  %vm1492_vm4 = vcmp.gt.f32.partialorder %v2355_v34, 20.0 }
 0x365   : > { %v1525_v19 = vsel %vm1520_vm3, %v2433_v45, %v1506_v18  ;;  %v1509_v48 = vsel %vm1493_vm1, %v2349_v26, %v1477_v38  ;;  %2021 = vtanh.f32 %v2368_v44  ;;  %v2599_v26 = vadd.f32 %v2323_v63, %v1211_v33 }
 0x366   : > { %1542 = vst.msk [vmem:[%s2478_s28 + $0x20] sm:$0xff] %vm1537_vm5, %v1525_v19  ;;  %v1528_v25 = vsel %vm1520_vm3, %v2453_v50, %v1509_v48  ;;  %v1372_v49 = vsel %vm1371_vm2, %v1369_v62, %v1366_v43  ;;  %v1395_v53 = vadd.f32 1.0, %v1394_v5  ;;  %v1463_v50 = vmax.f32 %v2359_v36, 0.0 }
 0x367   : > { %1545 = vst.msk [vmem:[%s2478_s28 + $0x38] sm:$0xff] %vm1537_vm5, %v1528_v25  ;;  %v1476_v47 = vadd.f32 %v1460_v40, %v1372_v49  ;;  %v2601_v45 = vpop.eup %2011  ;;  %v1304_v58 = vmul.f32 1.442695, %v1275_v1  ;;  %v2605_v59 = vadd.f32 %v1932_v46, %v2323_v63  ;;  %v1397_v60 = vand.u32 2147483647, %v2506_v61 }
 0x368   : > { %2023 = vtanh.f32 %v2377_v51  ;;  %v1400_v3 = vadd.f32 1.0, %v2601_v45  ;;  %v1386_v10 = vadd.f32 1.0, %v1385_v42  ;;  %v1258_v4 = vand.u32 2147483647, %v2599_v26 }
 0x369   : > { %v1508_v0 = vsel %vm1492_vm4, %v2355_v34, %v1476_v47  ;;  %2025 = vpow2.f32 %v1304_v58  ;;  %v1388_v11 = vand.u32 2147483647, %v2522_v12  ;;  %v1412_v34 = vmul.f32 -0.5, %v2564_v21 }
 0x36a   : > { %v1527_v6 = vsel %vm1520_vm3, %v2483_v35, %v1508_v0  ;;  %2027 = vlog2.f32 %v1400_v3  ;;  %v2620_v14 = vadd.f32 %v2323_v63, %v1221_v54  ;;  %v1396_v8 = vmul.f32 %v2506_v61, %v1395_v53 }
 0x36b   : > { %v2014_v52 = vpop.eup %2013  ;;  %1544 = vst.msk [vmem:[%s2478_s28 + $0x30] sm:$0xff] %vm1537_vm5, %v1527_v6  ;;  %v1274_v20 = vsub.f32 0.0, %v1258_v4  ;;  %v1261_v35 = vand.u32 2147483647, %v2605_v59  ;;  %vm1398_vm6 = vcmp.lt.f32.partialorder %v1397_v60, 0.0004427343  ;;  %2029 = vtanh.f32 %v2447_v57 }
 0x36c   : > { %v1393_v7 = vmul.f32 0.6931472, %v2014_v52  ;;  %vm1495_vm7 = vcmp.gt.f32.partialorder %v2359_v36, 20.0  ;;  %v1462_v17 = vmax.f32 %v2368_v44, 0.0  ;;  %v2016_v2 = vpop.eup %2015  ;;  %v1387_v23 = vmul.f32 %v2522_v12, %v1386_v10 }
 0x36d   : > { %v1302_v24 = vmul.f32 1.442695, %v1274_v20  ;;  %v1277_v63 = vsub.f32 0.0, %v1261_v35  ;;  %v1384_v15 = vmul.f32 0.6931472, %v2016_v2  ;;  %v1413_v61 = vadd.f32 1.0, %v1412_v34  ;;  %v2018_v28 = vpop.eup %2017 }
 0x36e   : > { %v1399_v9 = vsel %vm1398_vm6, %v1396_v8, %v1393_v7  ;;  %v1260_v30 = vand.u32 2147483647, %v2620_v14  ;;  %vm1389_vm8 = vcmp.lt.f32.partialorder %v1388_v11, 0.0004427343  ;;  %v1415_v32 = vand.u32 2147483647, %v2564_v21 }
 0x36f   : > { %v1479_v29 = vadd.f32 %v1463_v50, %v1399_v9  ;;  %2031 = vpow2.f32 %v1302_v24  ;;  %v1308_v33 = vmul.f32 1.442695, %v1277_v63  ;;  %v1390_v27 = vsel %vm1389_vm8, %v1387_v23, %v1384_v15 }
 0x370   : > { %v1403_v12 = vmul.f32 -0.5, %v2601_v45  ;;  %v1276_v31 = vsub.f32 0.0, %v1260_v30  ;;  %v2020_v16 = vpop.eup %2019  ;;  %v1478_v39 = vadd.f32 %v1462_v17, %v1390_v27  ;;  %vm1494_vm9 = vcmp.gt.f32.partialorder %v2368_v44, 20.0 }
 0x371   : > { %v1511_v13 = vsel %vm1495_vm7, %v2359_v36, %v1479_v29  ;;  %2033 = vpow2.f32 %v1308_v33  ;;  %v1411_v37 = vmul.f32 0.6931472, %v2020_v16  ;;  %v1414_v38 = vmul.f32 %v2564_v21, %v1413_v61 }
 0x372   : > { %v1530_v55 = vsel %vm1520_vm3, %v2018_v28, %v1511_v13  ;;  %v1306_v40 = vmul.f32 1.442695, %v1276_v31  ;;  %v2022_v36 = vpop.eup %2021  ;;  %v1510_v41 = vsel %vm1494_vm9, %v2368_v44, %v1478_v39  ;;  %vm1416_vm10 = vcmp.lt.f32.partialorder %v1415_v32, 0.0004427343 }
 0x373   : > { %1547 = vst.msk [vmem:[%s2478_s28 + $0x48] sm:$0xff] %vm1537_vm5, %v1530_v55  ;;  %v1465_v18 = vmax.f32 %v2377_v51, 0.0  ;;  %v1529_v43 = vsel %vm1520_vm3, %v2022_v36, %v1510_v41  ;;  %v1417_v62 = vsel %vm1416_vm10, %v1414_v38, %v1411_v37  ;;  %v1404_v5 = vadd.f32 1.0, %v1403_v12 }
 0x374   : > { %2035 = vpow2.f32 %v1306_v40  ;;  %1546 = vst.msk [vmem:[%s2478_s28 + $0x40] sm:$0xff] %vm1537_vm5, %v1529_v43  ;;  %v1406_v21 = vand.u32 2147483647, %v2601_v45  ;;  %vm1497_vm11 = vcmp.gt.f32.partialorder %v2377_v51, 20.0  ;;  %v1464_v50 = vmax.f32 %v2447_v57, 0.0 }
 0x375   : > { %v2024_v46 = vpop.eup %2023  ;;  %v1481_v19 = vadd.f32 %v1465_v18, %v1417_v62  ;;  %v1405_v47 = vmul.f32 %v2601_v45, %v1404_v5  ;;  %vm1496_vm13 = vcmp.gt.f32.partialorder %v2447_v57, 20.0  ;;  %v1467_v17 = vmax.f32 %v2543_v22, 0.0 }
 0x376   : > { %v2026_v48 = vpop.eup %2025  ;;  %vm1407_vm12 = vcmp.lt.f32.partialorder %v1406_v21, 0.0004427343  ;;  %vm1499_vm15 = vcmp.gt.f32.partialorder %v2543_v22, 20.0  ;;  %v1466_v12 = vmax.f32 %v2599_v26, 0.0  ;;  %vm1498_vm2 = vcmp.gt.f32.partialorder %v2599_v26, 20.0 }
 0x377   : > { %v2028_v44 = vpop.eup %2027  ;;  %v1513_v25 = vsel %vm1497_vm11, %v2377_v51, %v1481_v19  ;;  %v1427_v49 = vadd.f32 1.0, %v2026_v48  ;;  %v1430_v45 = vmul.f32 -0.5, %v2026_v48  ;;  %v1433_v34 = vand.u32 2147483647, %v2026_v48 }
 0x378   : > { %v1532_v42 = vsel %vm1520_vm3, %v2024_v46, %v1513_v25  ;;  %v1402_v1 = vmul.f32 0.6931472, %v2028_v44  ;;  %v2030_v53 = vpop.eup %2029  ;;  %vm1501_vm4 = vcmp.gt.f32.partialorder %v2605_v59, 20.0  ;;  %v1468_v19 = vmax.f32 %v2620_v14, 0.0 }
 0x379   : > { %1549 = vst.msk [vmem:[%s2478_s28 + $0x58] sm:$0xff] %vm1537_vm5, %v1532_v42  ;;  %2037 = vlog2.f32 %v1427_v49  ;;  %v1431_v11 = vadd.f32 1.0, %v1430_v45  ;;  %vm1434_vm14 = vcmp.lt.f32.partialorder %v1433_v34, 0.0004427343  ;;  %vm1500_vm7 = vcmp.gt.f32.partialorder %v2620_v14, 20.0 }
 0x37a   : > { %v1408_v58 = vsel %vm1407_vm12, %v1405_v47, %v1402_v1  ;;  %2039 = vtanh.f32 %v2543_v22 }
 0x37b   : > { %v1480_v54 = vadd.f32 %v1464_v50, %v1408_v58  ;;  %v1432_v20 = vmul.f32 %v2026_v48, %v1431_v11 }
 0x37c   : > { %v2032_v0 = vpop.eup %2031 }
 0x37d   : > { %v1512_v51 = vsel %vm1496_vm13, %v2447_v57, %v1480_v54  ;;  %v1418_v60 = vadd.f32 1.0, %v2032_v0  ;;  %v1421_v57 = vmul.f32 -0.5, %v2032_v0  ;;  %v1424_v24 = vand.u32 2147483647, %v2032_v0 }
 0x37e   : > { %v2034_v3 = vpop.eup %2033  ;;  %v1531_v6 = vsel %vm1520_vm3, %v2030_v53, %v1512_v51 }
 0x37f   : > { %1548 = vst.msk [vmem:[%s2478_s28 + $0x50] sm:$0xff] %vm1537_vm5, %v1531_v6  ;;  %2041 = vlog2.f32 %v1418_v60  ;;  %v1445_v10 = vadd.f32 1.0, %v2034_v3  ;;  %v1448_v35 = vmul.f32 -0.5, %v2034_v3  ;;  %v1422_v9 = vadd.f32 1.0, %v1421_v57 }
 0x380   : > { %v1451_v28 = vand.u32 2147483647, %v2034_v3  ;;  %vm1425_vm0 = vcmp.lt.f32.partialorder %v1424_v24, 0.0004427343 }
 0x381   : > { %v2036_v4 = vpop.eup %2035  ;;  %2043 = vlog2.f32 %v1445_v10  ;;  %v1449_v15 = vadd.f32 1.0, %v1448_v35  ;;  %v1423_v13 = vmul.f32 %v2032_v0, %v1422_v9 }
 0x382   : > { %v1436_v52 = vadd.f32 1.0, %v2036_v4  ;;  %v1439_v63 = vmul.f32 -0.5, %v2036_v4  ;;  %v1442_v37 = vand.u32 2147483647, %v2036_v4  ;;  %vm1452_vm1 = vcmp.lt.f32.partialorder %v1451_v28, 0.0004427343 }
 0x383   : > { %v1450_v39 = vmul.f32 %v2034_v3, %v1449_v15 }
 0x384   : > { %2045 = vlog2.f32 %v1436_v52  ;;  %v1440_v31 = vadd.f32 1.0, %v1439_v63  ;;  %vm1443_vm6 = vcmp.lt.f32.partialorder %v1442_v37, 0.0004427343 }
 0x385   : > { %2047 = vtanh.f32 %v2599_v26 }
 0x386   : > { %v2038_v7 = vpop.eup %2037  ;;  %2049 = vtanh.f32 %v2605_v59  ;;  %v1441_v5 = vmul.f32 %v2036_v4, %v1440_v31 }
 0x387   : > { %v1429_v8 = vmul.f32 0.6931472, %v2038_v7  ;;  %2051 = vtanh.f32 %v2620_v14  ;;  %v2040_v29 = vpop.eup %2039 }
 0x389   : > { %v1435_v2 = vsel %vm1434_vm14, %v1432_v20, %v1429_v8 }
 0x38a   : > { %v1483_v23 = vadd.f32 %v1467_v17, %v1435_v2 }
 0x38c   : > { %v2042_v61 = vpop.eup %2041  ;;  %v1515_v30 = vsel %vm1499_vm15, %v2543_v22, %v1483_v23  ;;  %v1469_v22 = vmax.f32 %v2605_v59, 0.0 }
 0x38d   : > { %v1534_v32 = vsel %vm1520_vm3, %v2040_v29, %v1515_v30  ;;  %v1420_v33 = vmul.f32 0.6931472, %v2042_v61 }
 0x38e   : > { %v2044_v27 = vpop.eup %2043  ;;  %1551 = vst.msk [vmem:[%s2478_s28 + $0x68] sm:$0xff] %vm1537_vm5, %v1534_v32 }
 0x38f   : > { %v1426_v16 = vsel %vm1425_vm0, %v1423_v13, %v1420_v33  ;;  %v1447_v55 = vmul.f32 0.6931472, %v2044_v27 }
 0x390   : > { %v1482_v38 = vadd.f32 %v1466_v12, %v1426_v16 }
 0x391   : > { %v2046_v40 = vpop.eup %2045  ;;  %v1453_v36 = vsel %vm1452_vm1, %v1450_v39, %v1447_v55 }
 0x392   : > { %v2048_v41 = vpop.eup %2047  ;;  %v1514_v18 = vsel %vm1498_vm2, %v2599_v26, %v1482_v38  ;;  %v1485_v43 = vadd.f32 %v1469_v22, %v1453_v36  ;;  %v1438_v62 = vmul.f32 0.6931472, %v2046_v40 }
 0x393   : > { %v1533_v46 = vsel %vm1520_vm3, %v2048_v41, %v1514_v18  ;;  %v2050_v21 = vpop.eup %2049 }
 0x394   : > { %1550 = vst.msk [vmem:[%s2478_s28 + $0x60] sm:$0xff] %vm1537_vm5, %v1533_v46  ;;  %v1517_v48 = vsel %vm1501_vm4, %v2605_v59, %v1485_v43  ;;  %v1444_v44 = vsel %vm1443_vm6, %v1441_v5, %v1438_v62  ;;  %v2052_v49 = vpop.eup %2051 }
 0x395   : > { %v1536_v26 = vsel %vm1520_vm3, %v2050_v21, %v1517_v48  ;;  %v1484_v25 = vadd.f32 %v1468_v19, %v1444_v44 }
 0x396   : > { %1553 = vst.msk [vmem:[%s2478_s28 + $0x78] sm:$0xff] %vm1537_vm5, %v1536_v26 }
 0x397   : > { %v1516_v42 = vsel %vm1500_vm7, %v2620_v14, %v1484_v25 }
 0x398   : > { %v1535_v1 = vsel %vm1520_vm3, %v2052_v49, %v1516_v42 }
 0x399   : > { %1552 = vst.msk [vmem:[%s2478_s28 + $0x70] sm:$0xff] %vm1537_vm5, %v1535_v1 }
 0x39a PF: > { %s19_s30 = sadd.s32 1, %s2059_s30  }
 0x39b   : > { %p16_p4 = scmp.ge.s32.totalorder %s19_s30, 4  }
 0x39d   :  { %18 = sbr.rel (!%p16_p4) target bundleno = 1 (0x1), region = 86 }

</bundles_post_ra>
